<compile_context>
chip_gen: v7x
topology: tpu7x:2x2x1
jax: 0.10.0
libtpu: 0.0.40
codegen_flags: <defaults>
</compile_context>

<pallas_src>
import jax
import jax.numpy as jnp
from jax import lax
from jax.experimental import pallas as pl
from jax.experimental.pallas import tpu as pltpu


_LANE = 128
_SUBLANE = 8


def _round_up(n, m):
    return ((n + m - 1) // m) * m


def _round_down(n, m):
    return (n // m) * m


def _choose_tiles(N, D, itemsize, block_rows, feats_budget_bytes):
    """Pick (TN, TK): row tile and reduction tile of the feats stream."""
    block_rows = max(int(block_rows), _LANE)
    # Rows per tile if the whole feature dim rides in one (double-buffered) block.
    max_rows = max(feats_budget_bytes // (2 * D * itemsize), 1)
    cap = min(block_rows, max_rows)
    if N <= cap:
        return N, D                                  # single full-N block, whole D
    if max_rows >= _LANE:
        return _round_down(cap, _LANE), D            # lane-aligned row tiles, whole D
    # Feature dim too wide for even a 128-row tile: tile the reduction too.
    TN = N if N < _LANE else _LANE
    TK = max(_LANE, _round_down(feats_budget_bytes // (2 * TN * itemsize), _LANE))
    TK = min(TK, D)
    return TN, TK


def _make_fc_kernel(D, TK):
    """x @ W^T + b, emitted as a lane-dense (O, TN) tile, f32 accumulation."""
    k_ragged = (D % TK) != 0

    def kernel(x_ref, w_ref, b_ref, o_ref, acc_ref):
        k = pl.program_id(1)

        @pl.when(k == 0)
        def _init():
            acc_ref[...] = jnp.zeros_like(acc_ref)

        x = x_ref[...]                      # (TN, TK)
        w = w_ref[...]                      # (O_pad, TK)
        if k_ragged:
            # The last K block reads out-of-bounds columns (garbage, possibly
            # NaN/Inf).  Zero BOTH operands there so 0*0 contributions vanish.
            lim = D - k * TK
            w = jnp.where(lax.broadcasted_iota(jnp.int32, w.shape, 1) < lim,
                          w, jnp.zeros_like(w))
            x = jnp.where(lax.broadcasted_iota(jnp.int32, x.shape, 1) < lim,
                          x, jnp.zeros_like(x))

        # (O_pad, TK) . (TN, TK) contracted on TK -> (O_pad, TN):
        # result is already lane-dense (instances on the lane axis).
        acc_ref[...] += lax.dot_general(
            w, x,
            dimension_numbers=(((1,), (1,)), ((), ())),
            preferred_element_type=jnp.float32)

        @pl.when(k == pl.num_programs(1) - 1)
        def _finalize():
            o_ref[...] = (acc_ref[...] + b_ref[...].astype(jnp.float32)
                          ).astype(o_ref.dtype)

    return kernel


def _linear_pallas(x, weight, bias, *, block_rows=1024,
                   feats_vmem_budget_bytes=16 * 1024 * 1024,
                   vmem_limit_bytes=32 * 1024 * 1024):
    """x: (N, D); weight: (O, D) (PyTorch Linear layout); bias: (O,).

    Returns x @ weight.T + bias via a Pallas TPU kernel tiled over N (and D
    when the feature dim is too wide for VMEM).
    """
    N, D = x.shape
    O = weight.shape[0]
    assert weight.shape == (O, D) and bias.shape == (O,)

    # Pad the (tiny) weight/bias to a sublane multiple; never pad feats.
    O_pad = _round_up(O, _SUBLANE)
    if O_pad != O:
        weight = jnp.pad(weight, ((0, O_pad - O), (0, 0)))
        bias = jnp.pad(bias, (0, O_pad - O))
    bias2d = bias.reshape(O_pad, 1)

    TN, TK = _choose_tiles(N, D, x.dtype.itemsize, block_rows,
                           feats_vmem_budget_bytes)
    grid = (pl.cdiv(N, TN), pl.cdiv(D, TK))

    cost = pl.CostEstimate(
        flops=2 * N * D * O,
        transcendentals=0,
        bytes_accessed=(N * D + O * D + N * O) * x.dtype.itemsize,
    )

    out_t = pl.pallas_call(
        _make_fc_kernel(D, TK),
        out_shape=jax.ShapeDtypeStruct((O_pad, N), x.dtype),
        grid_spec=pltpu.PrefetchScalarGridSpec(
            num_scalar_prefetch=0,
            grid=grid,
            in_specs=[
                pl.BlockSpec((TN, TK), lambda i, k: (i, k)),     # feats tile (streamed)
                pl.BlockSpec((O_pad, TK), lambda i, k: (0, k)),  # weight slab
                pl.BlockSpec((O_pad, 1), lambda i, k: (0, 0)),   # bias (resident)
            ],
            out_specs=pl.BlockSpec((O_pad, TN), lambda i, k: (0, i)),
            scratch_shapes=[pltpu.VMEM((O_pad, TN), jnp.float32)],
        ),
        compiler_params=pltpu.CompilerParams(
            dimension_semantics=("parallel", "arbitrary"),
            vmem_limit_bytes=vmem_limit_bytes,
        ),
        cost_estimate=cost,
    )(x, weight, bias2d)

    # (O_pad, N) lane-dense result -> (N, O); the transpose is O(N*O) elements.
    return out_t[:O, :].T


def iclassifier_forward(x, weight, bias, *, feature_extractor=None,
                        block_rows=1024,
                        feats_vmem_budget_bytes=16 * 1024 * 1024,
                        vmem_limit_bytes=32 * 1024 * 1024):
    """IClassifier.forward: (feats.view(N,-1), Linear(feats.view(N,-1))).

    feature_extractor: any JAX callable mapping x -> feats (identity default).
    weight: (output_class, feature_size)   (PyTorch nn.Linear layout)
    bias  : (output_class,)
    """
    # TODO(synk): the dsmil feature_extractor is an arbitrary injected nn.Module
    # (typically a CNN backbone); it has no fixed Pallas translation, so it is
    # accepted as a plain JAX callable (identity by default).
    feats = x if feature_extractor is None else feature_extractor(x)
    N = feats.shape[0]
    feats_flat = feats.reshape(N, -1)
    c = _linear_pallas(feats_flat, weight, bias, block_rows=block_rows,
                       feats_vmem_budget_bytes=feats_vmem_budget_bytes,
                       vmem_limit_bytes=vmem_limit_bytes)
    return feats_flat, c


if __name__ == "__main__":
    key = jax.random.PRNGKey(0)
    ks = jax.random.split(key, 10)

    # --- Cases 1/2: bag of N=8 instances, identity backbone, feature_size=32 ---
    N, C, H, W = 8, 2, 4, 4
    Dfeat = C * H * W
    x = jax.random.normal(ks[0], (N, C, H, W), dtype=jnp.float32)
    feats_ref = x.reshape(N, -1)
    bound = 1.0 / (Dfeat ** 0.5)

    # output_class = 1
    w1 = jax.random.uniform(ks[1], (1, Dfeat), jnp.float32, -bound, bound)
    b1 = jax.random.uniform(ks[2], (1,), jnp.float32, -bound, bound)
    feats1, c1 = iclassifier_forward(x, w1, b1)
    jax.block_until_ready((feats1, c1))
    ref1 = feats_ref @ w1.T + b1[None, :]
    assert feats1.shape == (N, Dfeat) and c1.shape == (N, 1)
    assert jnp.allclose(c1, ref1, atol=1e-5, rtol=1e-5)
    assert jnp.array_equal(feats1, feats_ref)

    # output_class = 4
    w2 = jax.random.uniform(ks[3], (4, Dfeat), jnp.float32, -bound, bound)
    b2 = jax.random.uniform(ks[4], (4,), jnp.float32, -bound, bound)
    feats2, c2 = iclassifier_forward(x, w2, b2)
    jax.block_until_ready((feats2, c2))
    ref2 = feats_ref @ w2.T + b2[None, :]
    assert c2.shape == (N, 4)
    assert jnp.allclose(c2, ref2, atol=1e-5, rtol=1e-5)
    assert jnp.array_equal(feats2, feats_ref)

    # --- Case 3: multi-tile ragged N (no pad), integer-valued data -> exact ---
    N3, D3, O3 = 300, 32, 4
    x3 = jax.random.randint(ks[5], (N3, D3), -3, 4).astype(jnp.float32)
    w3 = jax.random.randint(ks[6], (O3, D3), -3, 4).astype(jnp.float32)
    b3 = jax.random.randint(ks[7], (O3,), -3, 4).astype(jnp.float32)
    f3, c3 = iclassifier_forward(x3, w3, b3, block_rows=128)
    jax.block_until_ready(c3)
    ref3 = x3 @ w3.T + b3[None, :]
    assert c3.shape == (N3, O3)
    assert jnp.allclose(c3, ref3, atol=1e-3, rtol=1e-3)

    # --- Case 4: K-tiled reduction with a masked ragged last K block ---
    N4, D4, O4 = 200, 320, 4
    x4 = jax.random.randint(ks[8], (N4, D4), -3, 4).astype(jnp.float32)
    w4 = jax.random.randint(ks[9], (O4, D4), -3, 4).astype(jnp.float32)
    b4 = jnp.arange(O4, dtype=jnp.float32)
    f4, c4 = iclassifier_forward(x4, w4, b4, feats_vmem_budget_bytes=128 * 1024)
    jax.block_until_ready(c4)
    ref4 = x4 @ w4.T + b4[None, :]
    assert c4.shape == (N4, O4)
    assert jnp.allclose(c4, ref4, atol=1e-3, rtol=1e-3)

    print("KERNEL_OK")
</pallas_src>

<mosaic_0001>
module attributes {stable_mosaic.version = 11 : i64} {
  func.func @kernel(%arg0: i32, %arg1: i32, %arg2: memref<8x32xf32, #tpu.memory_space<vmem>>, %arg3: memref<8x32xf32, #tpu.memory_space<vmem>>, %arg4: memref<8x1xf32, #tpu.memory_space<vmem>>, %arg5: memref<8x8xf32, #tpu.memory_space<vmem>>, %arg6: memref<8x8xf32, #tpu.memory_space<vmem>>) attributes {dimension_semantics = [#tpu.dimension_semantics<parallel>, #tpu.dimension_semantics<arbitrary>], iteration_bounds = array<i64: 1, 1>, scalar_prefetch = 0 : i64, scratch_operands = 1 : i64, tpu.core_type = #tpu.core_type<tc>, window_params = [{transform_indices = @transform_0, window_bounds = array<i64: 8, 32>}, {transform_indices = @transform_1, window_bounds = array<i64: 8, 32>}, {pipeline_mode = #tpu.pipeline_mode<synchronous>, transform_indices = @transform_2, window_bounds = array<i64: 8, 1>}, {transform_indices = @transform_3, window_bounds = array<i64: 8, 8>}]} {
    %c0_i32 = arith.constant 0 : i32
    %0 = arith.cmpi eq, %arg1, %c0_i32 : i32
    %1 = arith.extui %0 : i1 to i32
    %c0_i32_0 = arith.constant 0 : i32
    %2 = arith.cmpi ne, %1, %c0_i32_0 : i32
    scf.if %2 {
      %cst_10 = arith.constant 0.000000e+00 : f32
      %12 = vector.broadcast %cst_10 : f32 to vector<8x8xf32>
      %c0_11 = arith.constant 0 : index
      %c0_12 = arith.constant 0 : index
      %13 = vector.load %arg6[%c0_11, %c0_12] : memref<8x8xf32, #tpu.memory_space<vmem>>, vector<8x8xf32>
      tpu.vector_store %arg6[%c0_11, %c0_12], %12 {strides = array<i32>} : memref<8x8xf32, #tpu.memory_space<vmem>>, vector<8x8xf32>,
    } else {
    }
    %c0 = arith.constant 0 : index
    %c0_1 = arith.constant 0 : index
    %3 = vector.load %arg2[%c0, %c0_1] : memref<8x32xf32, #tpu.memory_space<vmem>>, vector<8x32xf32>
    %c0_2 = arith.constant 0 : index
    %c0_3 = arith.constant 0 : index
    %4 = vector.load %arg3[%c0_2, %c0_3] : memref<8x32xf32, #tpu.memory_space<vmem>>, vector<8x32xf32>
    %c0_4 = arith.constant 0 : index
    %c0_5 = arith.constant 0 : index
    %5 = vector.load %arg6[%c0_4, %c0_5] : memref<8x8xf32, #tpu.memory_space<vmem>>, vector<8x8xf32>
    %cst = arith.constant dense<0.000000e+00> : vector<8x8xf32>
    %6 = tpu.matmul %4, %3, %cst {dimension_numbers = #tpu.dot_dimension_numbers<[1], [1], [0], [0], [0, 0, 1, 0], [], []>} : vector<8x32xf32>, vector<8x32xf32>, vector<8x8xf32> -> vector<8x8xf32>
    %7 = arith.addf %5, %6 : vector<8x8xf32>
    %c0_6 = arith.constant 0 : index
    %c0_7 = arith.constant 0 : index
    %8 = vector.load %arg6[%c0_6, %c0_7] : memref<8x8xf32, #tpu.memory_space<vmem>>, vector<8x8xf32>
    tpu.vector_store %arg6[%c0_6, %c0_7], %7 {strides = array<i32>} : memref<8x8xf32, #tpu.memory_space<vmem>>, vector<8x8xf32>,
    %c0_i32_8 = arith.constant 0 : i32
    %9 = arith.cmpi eq, %arg1, %c0_i32_8 : i32
    %10 = arith.extui %9 : i1 to i32
    %c0_i32_9 = arith.constant 0 : i32
    %11 = arith.cmpi ne, %10, %c0_i32_9 : i32
    scf.if %11 {
      %c0_10 = arith.constant 0 : index
      %c0_11 = arith.constant 0 : index
      %12 = vector.load %arg6[%c0_10, %c0_11] : memref<8x8xf32, #tpu.memory_space<vmem>>, vector<8x8xf32>
      %c0_12 = arith.constant 0 : index
      %c0_13 = arith.constant 0 : index
      %13 = vector.load %arg4[%c0_12, %c0_13] : memref<8x1xf32, #tpu.memory_space<vmem>>, vector<8x1xf32>
      %14 = vector.broadcast %13 : vector<8x1xf32> to vector<8x8xf32>
      %15 = arith.addf %12, %14 : vector<8x8xf32>
      %c0_14 = arith.constant 0 : index
      %c0_15 = arith.constant 0 : index
      %16 = vector.load %arg5[%c0_14, %c0_15] : memref<8x8xf32, #tpu.memory_space<vmem>>, vector<8x8xf32>
      tpu.vector_store %arg5[%c0_14, %c0_15], %15 {strides = array<i32>} : memref<8x8xf32, #tpu.memory_space<vmem>>, vector<8x8xf32>,
    } else {
    }
    return
  }
  func.func @transform_0(%arg0: i32, %arg1: i32) -> (i32, i32) {
    %c0_i32 = arith.constant 0 : i32
    return %arg0, %arg1 : i32, i32
  }
  func.func @transform_1(%arg0: i32, %arg1: i32) -> (i32, i32) {
    %c0_i32 = arith.constant 0 : i32
    %c0_i32_0 = arith.constant 0 : i32
    return %c0_i32, %arg1 : i32, i32
  }
  func.func @transform_2(%arg0: i32, %arg1: i32) -> (i32, i32) {
    %c0_i32 = arith.constant 0 : i32
    %c0_i32_0 = arith.constant 0 : i32
    %c0_i32_1 = arith.constant 0 : i32
    return %c0_i32, %c0_i32_0 : i32, i32
  }
  func.func @transform_3(%arg0: i32, %arg1: i32) -> (i32, i32) {
    %c0_i32 = arith.constant 0 : i32
    %c0_i32_0 = arith.constant 0 : i32
    return %c0_i32, %arg0 : i32, i32
  }
}

</mosaic_0001>

<bundles_post_ra>
// kernel: tpu_custom_call.1
= control target key start
LH: loop header
LB: loop body
LE: loop exit
PB: predicated region body
PF: predicated region fallthrough
CT: control target
= control target key end

     0   :  { %8 = vsyncpa [#allocation4], 0  ;;  %s264_s0 = inlined_call_operand.vmem [shape: f32[8,32], index: 0, kind: input, shape index: {}]   ;;  %s265_s1 = inlined_call_operand.hbm [shape: f32[8,32], index: 1, kind: input, shape index: {}]   ;;  %s266_s2 = inlined_call_operand.vmem [shape: f32[8,1], index: 2, kind: input, shape index: {}]   ;;  %s267_s3 = inlined_call_operand.hbm [shape: f32[8,8], index: 3, kind: output, shape index: {}]  }
   0x1   :  { %9 = vsyncpa [#allocation5], 0  ;;  %s206_s12 = smov [#allocation3]   ;;  %s158_s16 = scalar_lea.hbm %s265_s1, 128 }
   0x2   :  { %s18_s13 = sshll.u32 %s206_s12, 4  ;;  %p159_p0 = scmp.ne.s32.totalorder %s265_s1, %s158_s16  ;;  %s19_s13 = int_to_ptr.vmem [resolvable:$true] %s18_s13 }
   0x3   :  { %p162_p1 = scmp.lt.u32.totalorder %s158_s16, %s265_s1 }
   0x5   :  { %p164_p2 = pnand %p162_p1, %p159_p0 }
   0x7   :  { %167 = shalt.err (!%p164_p2)
}
   0x8   :  { %s168_s21 = scalar_lea.vmem %s19_s13, 128  ;;  %p173_p4 = scmp.lt.s32.totalorder %s19_s13, %s19_s13 }
   0x9   :  { %p169_p3 = scmp.ne.s32.totalorder %s19_s13, %s168_s21  ;;  %p174_p5 = scmp.lt.s32.totalorder %s168_s21, %s168_s21 }
   0xb   :  { %p175_p6 = por %p174_p5, %p173_p4 }
   0xd   :  { %p176_p7 = pnand %p175_p6, %p169_p3 }
   0xf   :  { %179 = shalt.err (!%p176_p7)
}
  0x10   :  { %21 = dma.hbm_to_vmem [thread:$0]  %s265_s1, 128, %s19_s13, [#allocation4]  }
  0x11   :  { %202 = dma.done.wait [#allocation4], 128  }
  0x12   :  { %203 = vsyncadd [#allocation4], 4294967168  ;;  %vm31_vm0 = vcmask 64512   ;;  %v207_v0 = vmov 0.0   ;;  %vm208_vm1 = vmmov 0   ;;  %v209_v1 = vmov 0  }
  0x13   :  { %32 = vst.msk [vmem:[#allocation2] sm:$0xff] %vm31_vm0, %v207_v0  ;;  %147 = vmatprep.subr.mxu0 %v207_v0  ;;  %149 = vmatprep.mubr.msk.f32.mxu0 %vm208_vm1, %v207_v0  ;;  %vm36_vm2 = vcmask 261120   ;;  %v33_v2 = vld [vmem:[%s264_s0] sm:$0xff]  ;;  %v34_v4 = vld [vmem:[#allocation3] sm:$0xff]  ;;  %s210_s1 = smov [#allocation6]  }
  0x14   :  { %157 = vset.pattern.permute.xlu0 %v209_v1  ;;  %v120_v3 = vld [vmem:[%s266_s2] sm:$0xff]  ;;  %148 = vmatpush3.xpose.msk.msra.mxu0 %vm36_vm2, %v33_v2  ;;  %s134_s28 = sshll.u32 %s210_s1, 4  ;;  %s135_s28 = int_to_ptr.vmem [resolvable:$true] %s134_s28 }
  0x15   :  { %123 = vperm.xlu0 %157, %v120_v3   ;;  %s180_s0 = scalar_lea.vmem %s135_s28, 128  ;;  %p185_p9 = scmp.lt.s32.totalorder %s135_s28, %s135_s28 }
  0x16   :  { %p181_p8 = scmp.ne.s32.totalorder %s135_s28, %s180_s0  ;;  %p186_p10 = scmp.lt.s32.totalorder %s180_s0, %s180_s0 }
  0x17   :  { %150 = vmatmul.mubr.msk.f32.vlgmr.msra.gmra.mrb[0].mxu0 %vm36_vm2, %v34_v4 }
  0x18   :  { %p187_p11 = por %p186_p10, %p185_p9 }
  0x1a   :  { %v35_v5 = vld [vmem:[#allocation2] sm:$0xff]  ;;  %p188_p12 = pnand %p187_p11, %p181_p8 }
  0x94   :  { %v124_v9 = vpop.permute.xlu0 %123 }
  0xea   :  { %v109_v6 = vpop.f32.mrb[0].mxu0 }
  0xeb   :  { %v113_v7 = vadd.f32 %v109_v6, %v35_v5  ;;  %v151_v8 = vpop.f32.mrb[1].mxu0 }
  0xed   :  { %115 = vst.msk [vmem:[#allocation2] sm:$0xff] %vm31_vm0, %v113_v7 }
  0xf4   :  { %v119_v10 = vld [vmem:[#allocation2] sm:$0xff] }
  0xf5   :  { %v126_v11 = vadd.f32 %v124_v9, %v119_v10 }
  0xf7   :  { %127 = vst.msk [vmem:[#allocation6] sm:$0xff] %vm31_vm0, %v126_v11 }
  0xf8   :  { %191 = shalt.err (!%p188_p12)
}
  0xf9   :  { %s192_s30 = scalar_lea.hbm %s267_s3, 128 }
  0xfa   :  { %p193_p13 = scmp.ne.s32.totalorder %s267_s3, %s192_s30  ;;  %p196_p0 = scmp.lt.u32.totalorder %s192_s30, %s267_s3 }
  0xfc   :  { %p198_p1 = pnand %p196_p0, %p193_p13 }
  0xfe   :  { %201 = shalt.err (!%p198_p1)
}
  0xff   :  { %137 = dma.vmem_to_hbm [thread:$0]  %s135_s28, 128, %s267_s3, [#allocation5]  }
 0x100   :  { %204 = dma.done.wait [#allocation5], 128  }
 0x101   :  { %205 = vsyncadd [#allocation5], 4294967168 }
 0x102   :  { %141 = vsyncpa [#allocation4], 1 }
 0x103   :  { %142 = vsyncpa [#allocation5], 1 }

</bundles_post_ra>
